<compile_context>
chip_gen: v7x
topology: tpu7x:2x2x1
jax: 0.10.0
libtpu: 0.0.40
codegen_flags: <defaults>
</compile_context>

<pallas_src>
import jax
import jax.numpy as jnp
from jax.experimental import pallas as pl
from jax.experimental.pallas import tpu as pltpu

_MIB = 1024 * 1024


def _mish_kernel(x_ref, o_ref):
    xf = x_ref[...].astype(jnp.float32)
    # mish(x) = x * tanh(softplus(x)) = x * (p^2 + 2p) / (p^2 + 2p + 2), p = e^x.
    # Clamp at 20 so p^2 stays finite; for x > 20 the rational factor is 1.0
    # to well under 1 f32 ulp, so no extra select is needed.
    xs = jnp.minimum(xf, 20.0)
    p = jnp.exp(xs)                      # EUP
    num = p * (p + 2.0)                  # p^2 + 2p
    den = num + 2.0
    r = pl.reciprocal(den, approx=True)  # EUP
    r = r * (2.0 - den * r)              # one Newton step (VPU, ~free) -> ~f32 exact
    o_ref[...] = (xf * num * r).astype(o_ref.dtype)


def _mish_jnp(x):
    """Pure-jnp Mish (stable softplus); used only for the <128-element tail."""
    xf = x.astype(jnp.float32)
    sp = jnp.maximum(xf, 0.0) + jnp.log1p(jnp.exp(-jnp.abs(xf)))
    return (xf * jnp.tanh(sp)).astype(x.dtype)


def _vmem_capacity_bytes():
    try:
        info = pltpu.get_tpu_info()
        return int(getattr(info, "vmem_capacity_bytes", 64 * _MIB))
    except Exception:
        return 64 * _MIB  # conservative (v7x-sized) fallback


def mish(x, *, lanes=128):
    """Elementwise Mish: x * tanh(softplus(x)). Any shape/dtype, forward only."""
    orig_shape = x.shape
    orig_dtype = x.dtype
    flat = x.reshape(-1)
    n = flat.shape[0]
    if n == 0:
        return x

    itemsize = jnp.dtype(orig_dtype).itemsize
    # sublane packing of the second-minor dim: 8 (32-bit), 16 (16-bit), 32 (8-bit)
    sub = {4: 8, 2: 16, 1: 32}.get(itemsize, 8)
    row_bytes = lanes * itemsize

    # All whole 128-lane rows go through Pallas; only a <128-elem tail is left.
    rows_bulk = n // lanes
    n_bulk = rows_bulk * lanes

    pieces = []
    if n_bulk > 0:
        xb = flat if n_bulk == n else flat[:n_bulk]
        x2d = xb.reshape(rows_bulk, lanes)

        vmem_cap = _vmem_capacity_bytes()
        # Block sized by bytes: 16 MiB on 128 MiB-VMEM chips (v5e/v6e),
        # 8 MiB on 64 MiB-VMEM chips (v7x).
        target_block_bytes = 16 * _MIB if vmem_cap >= 96 * _MIB else 8 * _MIB
        br = max(sub, target_block_bytes // row_bytes)
        # Aim for >= 4 grid steps once the input is >= 4 MiB so each v7x
        # TensorCore gets >= 2 steps and keeps its own double-buffering.
        if rows_bulk * row_bytes >= 4 * _MIB:
            br = min(br, pl.cdiv(rows_bulk, 4))
        br = min(br, rows_bulk)
        if rows_bulk > sub:
            br = max(sub, (br // sub) * sub)  # keep block sublane-aligned
        # else: br == rows_bulk, i.e. the block equals the full array dims.
        grid = (pl.cdiv(rows_bulk, br),)      # ragged last block masked by Pallas

        block_bytes = br * row_bytes
        vmem_limit = min(vmem_cap * 3 // 4,
                         max(32 * _MIB, 4 * block_bytes + 2 * _MIB))

        # NOTE: pipeline_mode=pl.Buffered(3) on the input spec is a sweep
        # candidate (review estimates low single-digit %); left at default 2.
        bulk = pl.pallas_call(
            _mish_kernel,
            out_shape=jax.ShapeDtypeStruct((rows_bulk, lanes), orig_dtype),
            grid_spec=pltpu.PrefetchScalarGridSpec(
                num_scalar_prefetch=0,
                grid=grid,
                in_specs=[pl.BlockSpec((br, lanes), lambda i: (i, 0))],
                out_specs=pl.BlockSpec((br, lanes), lambda i: (i, 0)),
            ),
            compiler_params=pltpu.CompilerParams(
                dimension_semantics=("parallel",),
                vmem_limit_bytes=int(vmem_limit),
            ),
            cost_estimate=pl.CostEstimate(
                flops=8 * n_bulk,
                transcendentals=2 * n_bulk,
                bytes_accessed=2 * n_bulk * itemsize,
            ),
        )(x2d)
        pieces.append(bulk.reshape(-1))

    if n_bulk < n:
        # <128 trailing elements: plain jnp (memory-trivial).
        # TODO(synk): the concatenate below re-writes the whole output (one
        # extra HBM pass) when n % 128 != 0; handling the partial last row
        # inside the kernel (masked store / manual DMA) would remove it.
        pieces.append(_mish_jnp(flat[n_bulk:]))

    out_flat = pieces[0] if len(pieces) == 1 else jnp.concatenate(pieces)
    return out_flat.reshape(orig_shape)


def mish_ref(x):
    # pure-JAX reference: x * tanh(softplus(x))
    return x * jnp.tanh(jax.nn.softplus(x))


# TODO(synk): only the forward pass of Mish_func is implemented (no custom backward).

if __name__ == "__main__":
    key = jax.random.PRNGKey(0)

    # NCHW input, like the PyTorch conv stack this activation lives in.
    x = jax.random.normal(key, (2, 4, 16, 16), dtype=jnp.float32) * 3.0
    y = jax.block_until_ready(mish(x))
    assert y.shape == x.shape and y.dtype == x.dtype
    assert jnp.allclose(y, mish_ref(x), atol=1e-5, rtol=1e-4)

    # awkward size: exercises the ragged-last-block bulk path + jnp tail
    x2 = jax.random.normal(jax.random.PRNGKey(1), (3, 5, 7, 11), dtype=jnp.float32) * 3.0
    y2 = jax.block_until_ready(mish(x2))
    assert jnp.allclose(y2, mish_ref(x2), atol=1e-5, rtol=1e-4)

    # bf16 with a row count that is not a multiple of the 16-row packing
    x3 = (jax.random.normal(jax.random.PRNGKey(2), (2, 3, 9, 50), dtype=jnp.float32)
          * 3.0).astype(jnp.bfloat16)
    y3 = jax.block_until_ready(mish(x3))
    y3_ref = mish_ref(x3.astype(jnp.float32)).astype(jnp.bfloat16)
    assert y3.dtype == jnp.bfloat16
    assert jnp.allclose(y3.astype(jnp.float32), y3_ref.astype(jnp.float32),
                        atol=5e-2, rtol=5e-2)

    print("KERNEL_OK")
</pallas_src>

<mosaic_0001>
module attributes {stable_mosaic.version = 11 : i64} {
  func.func @_mish_kernel(%arg0: i32, %arg1: memref<16x128xf32, #tpu.memory_space<vmem>>, %arg2: memref<16x128xf32, #tpu.memory_space<vmem>>) attributes {dimension_semantics = [#tpu.dimension_semantics<parallel>], iteration_bounds = array<i64: 1>, scalar_prefetch = 0 : i64, scratch_operands = 0 : i64, tpu.core_type = #tpu.core_type<tc>, window_params = [{transform_indices = @transform_0, window_bounds = array<i64: 16, 128>}, {transform_indices = @transform_1, window_bounds = array<i64: 16, 128>}]} {
    %c0 = arith.constant 0 : index
    %c0_0 = arith.constant 0 : index
    %0 = vector.load %arg1[%c0, %c0_0] : memref<16x128xf32, #tpu.memory_space<vmem>>, vector<16x128xf32>
    %cst = arith.constant 2.000000e+01 : f32
    %1 = vector.broadcast %cst : f32 to vector<16x128xf32>
    %2 = arith.minimumf %0, %1 : vector<16x128xf32>
    %3 = math.exp %2 : vector<16x128xf32>
    %cst_1 = arith.constant 2.000000e+00 : f32
    %4 = vector.broadcast %cst_1 : f32 to vector<16x128xf32>
    %5 = arith.addf %3, %4 : vector<16x128xf32>
    %6 = arith.mulf %3, %5 : vector<16x128xf32>
    %cst_2 = arith.constant 2.000000e+00 : f32
    %7 = vector.broadcast %cst_2 : f32 to vector<16x128xf32>
    %8 = arith.addf %6, %7 : vector<16x128xf32>
    %9 = tpu.reciprocal %8 {approx = true} : vector<16x128xf32> -> vector<16x128xf32>
    %10 = arith.mulf %8, %9 : vector<16x128xf32>
    %cst_3 = arith.constant 2.000000e+00 : f32
    %11 = vector.broadcast %cst_3 : f32 to vector<16x128xf32>
    %12 = arith.subf %11, %10 : vector<16x128xf32>
    %13 = arith.mulf %9, %12 : vector<16x128xf32>
    %14 = arith.mulf %0, %6 : vector<16x128xf32>
    %15 = arith.mulf %14, %13 : vector<16x128xf32>
    %c0_4 = arith.constant 0 : index
    %c0_5 = arith.constant 0 : index
    %16 = vector.load %arg2[%c0_4, %c0_5] : memref<16x128xf32, #tpu.memory_space<vmem>>, vector<16x128xf32>
    tpu.vector_store %arg2[%c0_4, %c0_5], %15 {strides = array<i32>} : memref<16x128xf32, #tpu.memory_space<vmem>>, vector<16x128xf32>,
    return
  }
  func.func @transform_0(%arg0: i32) -> (i32, i32) {
    %c0_i32 = arith.constant 0 : i32
    %c0_i32_0 = arith.constant 0 : i32
    return %arg0, %c0_i32 : i32, i32
  }
  func.func @transform_1(%arg0: i32) -> (i32, i32) {
    %c0_i32 = arith.constant 0 : i32
    %c0_i32_0 = arith.constant 0 : i32
    return %arg0, %c0_i32 : i32, i32
  }
}

</mosaic_0001>

<bundles_post_ra>
// kernel: tpu_custom_call.1
= control target key start
LH: loop header
LB: loop body
LE: loop exit
PB: predicated region body
PF: predicated region fallthrough
CT: control target
= control target key end

     0   :  { %6 = vsyncpa [#allocation3], 0  ;;  %s172_s0 = inlined_call_operand.hbm [shape: f32[16,128], index: 0, kind: input, shape index: {}]   ;;  %s173_s1 = inlined_call_operand.hbm [shape: f32[16,128], index: 1, kind: output, shape index: {}]  }
   0x1   :  { %7 = vsyncpa [#allocation4], 0  ;;  %s128_s6 = smov [#allocation2]   ;;  %s80_s10 = scalar_lea.hbm %s172_s0, 256 }
   0x2   :  { %s13_s7 = sshll.u32 %s128_s6, 4  ;;  %p81_p0 = scmp.ne.s32.totalorder %s172_s0, %s80_s10  ;;  %s14_s7 = int_to_ptr.vmem [resolvable:$true] %s13_s7 }
   0x3   :  { %p84_p1 = scmp.lt.u32.totalorder %s80_s10, %s172_s0 }
   0x5   :  { %p86_p2 = pnand %p84_p1, %p81_p0 }
   0x7   :  { %89 = shalt.err (!%p86_p2)
}
   0x8   :  { %s90_s15 = scalar_lea.vmem %s14_s7, 256  ;;  %p95_p4 = scmp.lt.s32.totalorder %s14_s7, %s14_s7 }
   0x9   :  { %p91_p3 = scmp.ne.s32.totalorder %s14_s7, %s90_s15  ;;  %p96_p5 = scmp.lt.s32.totalorder %s90_s15, %s90_s15 }
   0xb   :  { %p97_p6 = por %p96_p5, %p95_p4 }
   0xd   :  { %p98_p7 = pnand %p97_p6, %p91_p3 }
   0xf   :  { %101 = shalt.err (!%p98_p7)
}
  0x10   :  { %s129_s16 = smov 128   ;;  %s130_s17 = smov 8  }
  0x11   :  { %19 = dma.hbm_to_vmem [thread:$0]  %s172_s0, 256, %s14_s7, [#allocation3], %s129_s16, %s129_s16, %s130_s17  }
  0x12   :  { %124 = dma.done.wait [#allocation3], 256  }
  0x13   :  { %125 = vsyncadd [#allocation3], 4294967040  ;;  %v23_v0 = vld [vmem:[#allocation2] sm:$0xff]  ;;  %v24_v1 = vld [vmem:[#allocation2 + $0x8] sm:$0xff]  ;;  %s131_s0 = smov [#allocation5]  }
  0x14   :  { %v25_v2 = vmin.f32 %v23_v0, 20.0  ;;  %v26_v3 = vmin.f32 %v24_v1, 20.0  ;;  %s56_s20 = sshll.u32 %s131_s0, 4  ;;  %s57_s20 = int_to_ptr.vmem [resolvable:$true] %s56_s20 }
  0x15   :  { %s102_s21 = scalar_lea.vmem %s57_s20, 256  ;;  %p107_p9 = scmp.lt.s32.totalorder %s57_s20, %s57_s20 }
  0x16   :  { %v27_v4 = vmul.f32 1.442695, %v25_v2  ;;  %v29_v5 = vmul.f32 1.442695, %v26_v3  ;;  %p103_p8 = scmp.ne.s32.totalorder %s57_s20, %s102_s21  ;;  %p108_p10 = scmp.lt.s32.totalorder %s102_s21, %s102_s21 }
  0x18   :  { %72 = vpow2.f32 %v27_v4  ;;  %p109_p11 = por %p108_p10, %p107_p9 }
  0x19   :  { %74 = vpow2.f32 %v29_v5 }
  0x1a   :  { %p110_p12 = pnand %p109_p11, %p103_p8 }
  0x22   :  { %v73_v6 = vpop.eup %72 }
  0x23   :  { %v75_v7 = vpop.eup %74  ;;  %v31_v8 = vadd.f32 2.0, %v73_v6 }
  0x24   :  { %v32_v9 = vadd.f32 2.0, %v75_v7 }
  0x25   :  { %v33_v10 = vmul.f32 %v73_v6, %v31_v8 }
  0x26   :  { %v34_v11 = vmul.f32 %v75_v7, %v32_v9 }
  0x27   :  { %v35_v12 = vadd.f32 2.0, %v33_v10  ;;  %v45_v19 = vmul.f32 %v33_v10, %v23_v0 }
  0x28   :  { %v36_v13 = vadd.f32 2.0, %v34_v11  ;;  %v46_v21 = vmul.f32 %v34_v11, %v24_v1 }
  0x29   :  { %76 = vrcp.f32 %v35_v12 }
  0x2a   :  { %78 = vrcp.f32 %v36_v13 }
  0x33   :  { %v77_v14 = vpop.eup %76 }
  0x34   :  { %v79_v15 = vpop.eup %78  ;;  %v39_v16 = vmul.f32 %v77_v14, %v35_v12 }
  0x35   :  { %v40_v17 = vmul.f32 %v79_v15, %v36_v13 }
  0x36   :  { %v41_v18 = vsub.f32 2.0, %v39_v16 }
  0x37   :  { %v42_v20 = vsub.f32 2.0, %v40_v17 }
  0x38   :  { %v43_v22 = vmul.f32 %v77_v14, %v41_v18 }
  0x39   :  { %v44_v23 = vmul.f32 %v79_v15, %v42_v20 }
  0x3a   :  { %v47_v24 = vmul.f32 %v45_v19, %v43_v22 }
  0x3b   :  { %v48_v25 = vmul.f32 %v46_v21, %v44_v23 }
  0x3c   :  { %49 = vst [vmem:[#allocation5] sm:$0xff] %v47_v24 }
  0x3d   :  { %50 = vst [vmem:[#allocation5 + $0x8] sm:$0xff] %v48_v25 }
  0x3e   :  { %113 = shalt.err (!%p110_p12)
}
  0x3f   :  { %s114_s24 = scalar_lea.hbm %s173_s1, 256 }
  0x40   :  { %p115_p13 = scmp.ne.s32.totalorder %s173_s1, %s114_s24  ;;  %p118_p0 = scmp.lt.u32.totalorder %s114_s24, %s173_s1 }
  0x42   :  { %p120_p1 = pnand %p118_p0, %p115_p13 }
  0x44   :  { %123 = shalt.err (!%p120_p1)
}
  0x45   :  { %62 = dma.vmem_to_hbm [thread:$0]  %s57_s20, 256, %s173_s1, [#allocation4], %s129_s16, %s129_s16, %s130_s17  }
  0x46   :  { %126 = dma.done.wait [#allocation4], 256  }
  0x47   :  { %127 = vsyncadd [#allocation4], 4294967040 }
  0x48   :  { %66 = vsyncpa [#allocation3], 1 }
  0x49   :  { %67 = vsyncpa [#allocation4], 1 }

</bundles_post_ra>
